<compile_context>
chip_gen: v5e
topology: v5e:2x2
jax: 0.10.0
libtpu: 0.0.40
codegen_flags: <defaults>
</compile_context>

<pallas_src>
import functools
import math

import numpy as np
import jax
import jax.numpy as jnp
from jax import lax
from jax.experimental import pallas as pl
from jax.experimental.pallas import tpu as pltpu

_ROW_BLOCK = 512  # rows per grid step when N is large


def _timesteps_kernel(t_ref, o_ref, *, half_dim, log_theta, shift, scale,
                      flip_sin_to_cos):
    """t_ref: (bn, 1) f32; o_ref: (bn, 2*half_dim) in the requested out dtype."""
    # Static frequency table built in-kernel: iota -> * c -> exp  (no operand DMA).
    c = jnp.float32(-log_theta / (half_dim - shift))
    i = lax.broadcasted_iota(jnp.int32, (1, half_dim), 1).astype(jnp.float32)
    freqs = jnp.exp(i * c)                       # (1, half) f32, EUP
    if scale != 1:                               # static branch: fold scale into freqs
        freqs = freqs * jnp.float32(scale)

    t = t_ref[...]                               # (bn, 1) f32
    arg = t * freqs                              # (bn, half) lane-broadcast multiply
    sin = jnp.sin(arg)
    cos = jnp.cos(arg)

    # Two lane-aligned half-width stores instead of a concatenate: no (bn, 2h)
    # VMEM temporary, no relayout.  f32 compute, cast only at the store.
    if flip_sin_to_cos:                          # [cos | sin]
        o_ref[:, :half_dim] = cos.astype(o_ref.dtype)
        o_ref[:, half_dim:] = sin.astype(o_ref.dtype)
    else:                                        # [sin | cos]
        o_ref[:, :half_dim] = sin.astype(o_ref.dtype)
        o_ref[:, half_dim:] = cos.astype(o_ref.dtype)


@functools.lru_cache(maxsize=None)
def _build_timesteps_call(n, num_channels, flip_sin_to_cos, downscale_freq_shift,
                          scale, time_theta, out_dtype):
    half = num_channels // 2
    kernel = functools.partial(
        _timesteps_kernel, half_dim=half, log_theta=math.log(time_theta),
        shift=float(downscale_freq_shift), scale=scale,
        flip_sin_to_cos=bool(flip_sin_to_cos))

    if n <= _ROW_BLOCK:
        # Tiny N (diffusion sampling): gridless — a grid is pure overhead here.
        call = pl.pallas_call(
            kernel,
            out_shape=jax.ShapeDtypeStruct((n, num_channels), out_dtype),
            in_specs=[pl.BlockSpec((n, 1), lambda: (0, 0))],
            out_specs=pl.BlockSpec((n, num_channels), lambda: (0, 0)),
        )
    else:
        # Large N (e.g. per-sample timesteps in training): parallel 1-D grid over
        # rows so v7x's two TensorCores split the work; >=512-row lane-dense tiles
        # amortize the per-step pipeline overhead.  VMEM footprint is tiny.
        call = pl.pallas_call(
            kernel,
            out_shape=jax.ShapeDtypeStruct((n, num_channels), out_dtype),
            grid=(pl.cdiv(n, _ROW_BLOCK),),
            in_specs=[pl.BlockSpec((_ROW_BLOCK, 1), lambda i: (i, 0))],
            out_specs=pl.BlockSpec((_ROW_BLOCK, num_channels), lambda i: (i, 0)),
            compiler_params=pltpu.CompilerParams(
                dimension_semantics=("parallel",)),
        )
    return jax.jit(call)   # guarantee the no-retrace fast path for eager callers


def timesteps_embedding(timesteps, *, num_channels=256, flip_sin_to_cos=True,
                        downscale_freq_shift=0.0, scale=1, time_theta=10000,
                        dtype=jnp.float32):
    """Pallas TPU equivalent of Timesteps.forward.  timesteps: (N,) float/int."""
    # TODO(synk): diffusers zero-pads one column when num_channels is odd; only
    # the even case (Bria uses 256) is implemented.
    assert num_channels % 2 == 0, "odd num_channels not supported"
    n = timesteps.shape[0]
    call = _build_timesteps_call(n, num_channels, bool(flip_sin_to_cos),
                                 float(downscale_freq_shift), scale, time_theta,
                                 np.dtype(dtype))
    t2d = timesteps.astype(jnp.float32).reshape(n, 1)
    return call(t2d)


def _reference(timesteps, num_channels, flip_sin_to_cos, downscale_freq_shift,
               scale, max_period):
    """Pure-JAX mirror of diffusers.get_timestep_embedding (the PyTorch path)."""
    half = num_channels // 2
    exponent = -math.log(max_period) * jnp.arange(half, dtype=jnp.float32)
    exponent = exponent / (half - downscale_freq_shift)
    freqs = jnp.exp(exponent)
    emb = timesteps.astype(jnp.float32)[:, None] * freqs[None, :]
    emb = scale * emb
    emb = jnp.concatenate([jnp.sin(emb), jnp.cos(emb)], axis=-1)
    if flip_sin_to_cos:
        emb = jnp.concatenate([emb[:, half:], emb[:, :half]], axis=-1)
    return emb


if __name__ == "__main__":
    key = jax.random.PRNGKey(0)
    num_channels = 256        # Timesteps(num_channels=256) in transformer_bria
    time_theta = 10000

    # --- small-N sampling case (gridless), Bria config ---
    n = 8
    timesteps = jax.random.uniform(key, (n,), jnp.float32, 0.0, 1000.0)
    out = timesteps_embedding(timesteps, num_channels=num_channels,
                              flip_sin_to_cos=True, downscale_freq_shift=0.0,
                              scale=1, time_theta=time_theta)
    out = jax.block_until_ready(out)
    ref = _reference(timesteps, num_channels, True, 0.0, 1, time_theta)
    assert out.shape == (n, num_channels)
    assert jnp.allclose(out, ref, atol=1e-3, rtol=1e-3)

    # --- other static options: flip=False, nonzero shift, scale != 1 ---
    out2 = timesteps_embedding(timesteps, num_channels=num_channels,
                               flip_sin_to_cos=False, downscale_freq_shift=1.0,
                               scale=2, time_theta=time_theta)
    out2 = jax.block_until_ready(out2)
    ref2 = _reference(timesteps, num_channels, False, 1.0, 2, time_theta)
    assert jnp.allclose(out2, ref2, atol=1e-3, rtol=1e-3)

    # --- bf16 output (halved writeback; compute stays f32, cast on store) ---
    out3 = timesteps_embedding(timesteps, num_channels=num_channels,
                               flip_sin_to_cos=True, downscale_freq_shift=0.0,
                               scale=1, time_theta=time_theta,
                               dtype=jnp.bfloat16)
    out3 = jax.block_until_ready(out3)
    assert out3.dtype == jnp.bfloat16
    assert jnp.allclose(out3.astype(jnp.float32), ref, atol=1e-2, rtol=1e-2)

    # --- large-N training-style case: exercises the parallel gridded path ---
    n_big = 1024
    timesteps_big = jax.random.uniform(jax.random.PRNGKey(1), (n_big,),
                                       jnp.float32, 0.0, 1000.0)
    out4 = timesteps_embedding(timesteps_big, num_channels=num_channels,
                               flip_sin_to_cos=True, downscale_freq_shift=0.0,
                               scale=1, time_theta=time_theta)
    out4 = jax.block_until_ready(out4)
    ref4 = _reference(timesteps_big, num_channels, True, 0.0, 1, time_theta)
    assert jnp.allclose(out4, ref4, atol=1e-3, rtol=1e-3)

    print("KERNEL_OK")
</pallas_src>

<mosaic_0001>
module attributes {stable_mosaic.version = 11 : i64} {
  func.func @_timesteps_kernel(%arg0: memref<8x1xf32, #tpu.memory_space<vmem>>, %arg1: memref<8x256xf32, #tpu.memory_space<vmem>>) attributes {dimension_semantics = [], scalar_prefetch = 0 : i64, scratch_operands = 0 : i64, tpu.core_type = #tpu.core_type<tc>} {
    %0 = tpu.iota {dimensions = array<i32: 1>} : vector<1x128xi32>
    %1 = arith.sitofp %0 : vector<1x128xi32> to vector<1x128xf32>
    %cst = arith.constant -0.0719557852 : f32
    %2 = vector.broadcast %cst : f32 to vector<1x128xf32>
    %3 = arith.mulf %1, %2 : vector<1x128xf32>
    %4 = math.exp %3 : vector<1x128xf32>
    %c0 = arith.constant 0 : index
    %c0_0 = arith.constant 0 : index
    %5 = vector.load %arg0[%c0, %c0_0] : memref<8x1xf32, #tpu.memory_space<vmem>>, vector<8x1xf32>
    %6 = vector.broadcast %5 : vector<8x1xf32> to vector<8x128xf32>
    %7 = vector.broadcast %4 : vector<1x128xf32> to vector<8x128xf32>
    %8 = arith.mulf %6, %7 : vector<8x128xf32>
    %9 = math.sin %8 : vector<8x128xf32>
    %10 = math.cos %8 : vector<8x128xf32>
    %c0_1 = arith.constant 0 : index
    %c0_2 = arith.constant 0 : index
    %11 = vector.load %arg1[%c0_1, %c0_2] : memref<8x256xf32, #tpu.memory_space<vmem>>, vector<8x128xf32>
    tpu.vector_store %arg1[%c0_1, %c0_2], %10 {strides = array<i32>} : memref<8x256xf32, #tpu.memory_space<vmem>>, vector<8x128xf32>,
    %c0_3 = arith.constant 0 : index
    %c128 = arith.constant 128 : index
    %12 = vector.load %arg1[%c0_3, %c128] : memref<8x256xf32, #tpu.memory_space<vmem>>, vector<8x128xf32>
    tpu.vector_store %arg1[%c0_3, %c128], %9 {strides = array<i32>} : memref<8x256xf32, #tpu.memory_space<vmem>>, vector<8x128xf32>,
    return
  }
}

</mosaic_0001>

<bundles_post_ra>
// kernel: tpu_custom_call.1
= control target key start
LH: loop header
LB: loop body
LE: loop exit
PB: predicated region body
PF: predicated region fallthrough
CT: control target
= control target key end

     0   :  { %v392_v1 = vmov 0   ;;  %s477_s0 = inlined_call_operand.vmem [shape: f32[8,1], index: 0, kind: input, shape index: {}]   ;;  %s478_s1 = inlined_call_operand.hbm [shape: f32[8,256], index: 1, kind: output, shape index: {}]  }
   0x1   :  { %v15_v0 = vld [vmem:[%s477_s0] sm:$0xff]  ;;  %363 = vset.pattern.permute.xlu0 %v392_v1 }
   0x2   :  { %18 = vperm.xlu0 %363, %v15_v0  }
   0x3   :  { %6 = vsyncpa [#allocation3], 0  ;;  %v9_v2 = vlaneseq  ;;  %v393_v21 = vmov 683565275   ;;  %v394_v23 = vmov 2475754826  }
   0x4   :  { %v395_v26 = vmov 2131351028   ;;  %v396_v29 = vmov 2102212464   ;;  %v397_v32 = vmov 920167782  }
   0x5   :  { %v10_v3 = vand.u32 127, %v9_v2  ;;  %v398_v35 = vmov 1326507024   ;;  %s399_s0 = smov [#allocation2]   ;;  %s340_s11 = sshll.u32 %s478_s1, 4  ;;  %s341_s11 = int_to_ptr.hbm [resolvable:$true] %s340_s11 }
   0x6   :  { %s338_s8 = sshll.u32 %s399_s0, 4  ;;  %s339_s8 = int_to_ptr.vmem [resolvable:$true] %s338_s8 }
   0x7   :  { %v11_v4 = vcvt.s32.f32 %v10_v3 }
   0x9   :  { %v12_v5 = vmul.f32 -0.071955785, %v11_v4 }
   0xb   :  { %v13_v6 = vmul.f32 1.442695, %v12_v5 }
   0xd   :  { %364 = vpow2.f32 %v13_v6 }
  0x13   :  { %v365_v7 = vpop.eup %364 }
  0x74   :  { %v19_v8 = vpop.permute.xlu0 %18 }
  0x75   :  { %v414_v9 = vmul.f32 %v365_v7, %v19_v8 }
  0x77   :  { %v25_v10 = vand.u32 2139095040, %v414_v9  ;;  %v22_v13 = vand.u32 2147483647, %v414_v9  ;;  %vm24_vm12 = vcmp.lt.s32.totalorder %v414_v9, 0 }
  0x79   :  { %v26_v11 = vshrl.u32 %v25_v10, 23  ;;  %v29_v15 = vand.u32 8388607, %v22_v13  ;;  %vm23_vm13 = vcmp.le.f32.partialorder %v22_v13, 0.7853982 }
  0x7b   :  { %v349_v12 = vadd.s32 4294967169, %v26_v11  ;;  %v30_v19 = vor.u32 8388608, %v29_v15 }
  0x7d   :  { %v32_v14 = vadd.s32 1, %v349_v12  ;;  %v431_v42 = vshll.u32 %v30_v19, 8 }
  0x7f   :  { %vm33_vm0 = vcmp.gt.s32.totalorder %v32_v14, 0  ;;  %v71_v51 = vand.u32 65535, %v431_v42  ;;  %v72_v52 = vshrl.u32 %v431_v42, 16 }
  0x80   :  { %v34_v16 = vsel %vm33_vm0, %v32_v14, 0 }
  0x81   :  { %v36_v17 = vand.u32 31, %v34_v16  ;;  %v422_v20 = vshrl.u32 %v34_v16, 5 }
  0x83   :  { %v420_v18 = vsub.s32 32, %v36_v17  ;;  %v39_v22 = vshll.u32 %v393_v21, %v36_v17  ;;  %v42_v24 = vshll.u32 %v394_v23, %v36_v17  ;;  %v45_v28 = vshll.u32 %v395_v26, %v36_v17 }
  0x84   :  { %v48_v31 = vshll.u32 %v396_v29, %v36_v17  ;;  %v51_v34 = vshll.u32 %v397_v32, %v36_v17  ;;  %vm54_vm1 = vcmp.lt.s32.totalorder %v422_v20, 1  ;;  %vm57_vm2 = vcmp.lt.s32.totalorder %v422_v20, 4 }
  0x85   :  { %v40_v25 = vshrl.u32 %v394_v23, %v420_v18  ;;  %v43_v27 = vshrl.u32 %v395_v26, %v420_v18  ;;  %v46_v30 = vshrl.u32 %v396_v29, %v420_v18  ;;  %v49_v33 = vshrl.u32 %v397_v32, %v420_v18 }
  0x86   :  { %v52_v36 = vshrl.u32 %v398_v35, %v420_v18  ;;  %vm56_vm3 = vcmp.lt.s32.totalorder %v422_v20, 3  ;;  %vm55_vm4 = vcmp.lt.s32.totalorder %v422_v20, 2  ;;  %v38_v16 = vshrl.u32 %v393_v21, %v420_v18 }
  0x87   :  { %v41_v37 = vor.u32 %v40_v25, %v39_v22  ;;  %v44_v38 = vor.u32 %v43_v27, %v42_v24  ;;  %v47_v39 = vor.u32 %v46_v30, %v45_v28  ;;  %v50_v40 = vor.u32 %v49_v33, %v48_v31 }
  0x88   :  { %v53_v41 = vor.u32 %v52_v36, %v51_v34 }
  0x89   :  { %v62_v43 = vsel %vm54_vm1, %v41_v37, %v44_v38  ;;  %v66_v44 = vsel %vm54_vm1, %v44_v38, %v47_v39  ;;  %v63_v45 = vsel %vm57_vm2, %v50_v40, 920167782  ;;  %v59_v12 = vsel %vm57_vm2, %v47_v39, 2102212464 }
  0x8a   :  { %v67_v46 = vsel %vm57_vm2, %v53_v41, 1326507024  ;;  %v64_v47 = vsel %vm56_vm3, %v47_v39, %v63_v45  ;;  %v58_v25 = vsel %vm54_vm1, %v38_v16, %v41_v37  ;;  %v60_v26 = vsel %vm56_vm3, %v44_v38, %v59_v12 }
  0x8b   :  { %v68_v48 = vsel %vm56_vm3, %v50_v40, %v67_v46  ;;  %v65_v49 = vsel %vm55_vm4, %v62_v43, %v64_v47  ;;  %v61_v18 = vsel %vm55_vm4, %v58_v25, %v60_v26 }
  0x8c   :  { %v69_v50 = vsel %vm55_vm4, %v66_v44, %v68_v48  ;;  %v95_v55 = vand.u32 65535, %v65_v49  ;;  %v96_v56 = vshrl.u32 %v65_v49, 16  ;;  %v115_v33 = vmul.u32 %v431_v42, %v61_v18 }
  0x8d   :  { %v73_v53 = vand.u32 65535, %v69_v50  ;;  %v74_v54 = vshrl.u32 %v69_v50, 16  ;;  %vm165_vm4 = vweird.f32 %v414_v9 }
  0x8e   :  { %v98_v59 = vmul.u32 %v96_v56, %v71_v51  ;;  %v99_v60 = vmul.u32 %v95_v55, %v72_v52  ;;  %v97_v0 = vmul.u32 %v95_v55, %v71_v51  ;;  %v100_v5 = vmul.u32 %v96_v56, %v72_v52 }
  0x8f   :  { %v76_v57 = vmul.u32 %v74_v54, %v71_v51  ;;  %v77_v58 = vmul.u32 %v73_v53, %v72_v52  ;;  %v75_v61 = vmul.u32 %v73_v53, %v71_v51  ;;  %v78_v63 = vmul.u32 %v74_v54, %v72_v52 }
  0x90   :  { %v101_v2 = vshll.u32 %v98_v59, 16  ;;  %v103_v7 = vshll.u32 %v99_v60, 16  ;;  %v102_v23 = vshrl.u32 %v98_v59, 16  ;;  %v104_v29 = vshrl.u32 %v99_v60, 16 }
  0x91   :  { %v79_v62 = vshll.u32 %v76_v57, 16  ;;  %v81_v3 = vshll.u32 %v77_v58, 16  ;;  %v80_v17 = vshrl.u32 %v76_v57, 16  ;;  %v82_v27 = vshrl.u32 %v77_v58, 16 }
  0x92   :  { %vm105_vm6 = vc.u32 %v97_v0, %v101_v2  ;;  %v107_v8 = vadd.s32 %v101_v2, %v97_v0 }
  0x93   :  { %vm83_vm5 = vc.u32 %v75_v61, %v79_v62  ;;  %v85_v4 = vadd.s32 %v79_v62, %v75_v61  ;;  %v106_v11 = vsel %vm105_vm6, 1, %v392_v1 }
  0x94   :  { %v84_v6 = vsel %vm83_vm5, 1, %v392_v1  ;;  %v108_v15 = vadd.s32 %v106_v11, %v100_v5  ;;  %vm109_vm8 = vc.u32 %v107_v8, %v103_v7  ;;  %v111_v32 = vadd.s32 %v107_v8, %v103_v7 }
  0x95   :  { %v86_v10 = vadd.s32 %v84_v6, %v78_v63  ;;  %vm87_vm7 = vc.u32 %v85_v4, %v81_v3  ;;  %v110_v22 = vsel %vm109_vm8, 1, %v392_v1 }
  0x96   :  { %v88_v14 = vsel %vm87_vm7, 1, %v392_v1  ;;  %v112_v24 = vadd.s32 %v110_v22, %v108_v15 }
  0x97   :  { %v90_v19 = vadd.s32 %v88_v14, %v86_v10 }
  0x98   :  { %v113_v30 = vadd.s32 %v112_v24, %v102_v23 }
  0x99   :  { %v91_v28 = vadd.s32 %v90_v19, %v80_v17 }
  0x9a   :  { %v114_v21 = vadd.s32 %v113_v30, %v104_v29 }
  0x9b   :  { %v92_v31 = vadd.s32 %v91_v28, %v82_v27 }
  0x9c   :  { %v118_v1 = vadd.s32 1, %v114_v21 }
  0x9d   :  { %vm117_vm9 = vc.u32 %v92_v31, %v111_v32  ;;  %v116_v20 = vadd.s32 %v111_v32, %v92_v31 }
  0x9e   :  { %v119_v34 = vsel %vm117_vm9, %v118_v1, %v114_v21 }
  0x9f   :  { %v120_v35 = vadd.s32 %v119_v34, %v115_v33 }
  0xa1   :  { %v121_v36 = vadd.s32 536870912, %v120_v35 }
  0xa3   :  { %v122_v37 = vshrl.u32 %v121_v36, 30 }
  0xa5   :  { %v123_v39 = vshll.u32 %v122_v37, 30  ;;  %v146_v58 = vsub.s32 4, %v122_v37 }
  0xa7   :  { %v124_v38 = vsub.s32 %v120_v35, %v123_v39  ;;  %v147_v63 = vsel %vm24_vm12, %v146_v58, %v122_v37 }
  0xa8   :  { %v149_v3 = vsel %vm23_vm13, 0, %v147_v63 }
  0xa9   :  { %vm125_vm10 = vcmp.lt.s32.totalorder %v124_v38, 0  ;;  %v126_v40 = vsub.s32 0, %v124_v38  ;;  %v166_v8 = vadd.s32 3, %v149_v3  ;;  %v321_v14 = vand.u32 3, %v149_v3 }
  0xab   :  { %v127_v41 = vsel %vm125_vm10, %v126_v40, %v124_v38  ;;  %v167_v15 = vand.u32 3, %v166_v8  ;;  %vm322_vm14 = vcmp.lt.s32.totalorder %v321_v14, 2  ;;  %vm323_vm15 = vcmp.eq.s32.totalorder %v321_v14, 0 }
  0xac   :  { %v128_v43 = vclz %v127_v41  ;;  %vm326_vm3 = vcmp.eq.s32.totalorder %v321_v14, 2 }
  0xad   :  { %vm168_vm0 = vcmp.lt.s32.totalorder %v167_v15, 2  ;;  %vm169_vm1 = vcmp.eq.s32.totalorder %v167_v15, 0  ;;  %vm172_vm2 = vcmp.eq.s32.totalorder %v167_v15, 2 }
  0xae   :  { %v350_v44 = vadd.s32 4294967294, %v128_v43 }
  0xb0   :  { %vm351_vm11 = vcmp.lt.s32.totalorder %v350_v44, 0 }
  0xb1   :  { %v131_v45 = vsel %vm351_vm11, 0, %v350_v44 }
  0xb2   :  { %v132_v46 = vsub.s32 32, %v131_v45  ;;  %v136_v47 = vsub.s32 4294967266, %v131_v45  ;;  %v133_v48 = vshll.u32 %v124_v38, %v131_v45 }
  0xb4   :  { %v134_v49 = vshrl.u32 %v116_v20, %v132_v46  ;;  %v137_v50 = vadd.s32 127, %v136_v47 }
  0xb6   :  { %v135_v42 = vor.u32 %v134_v49, %v133_v48  ;;  %v138_v51 = vshll.u32 %v137_v50, 23 }
  0xb8   :  { %v139_v52 = vor.u32 4788187, %v138_v51  ;;  %v142_v54 = vcvt.s32.f32 %v135_v42 }
  0xba   :  { %v140_v53 = vand.u32 2147483647, %v139_v52 }
  0xbc   :  { %v143_v55 = vmul.f32 %v142_v54, %v140_v53 }
  0xbe   :  { %v144_v56 = vxor.u32 2147483648, %v143_v55 }
  0xc0   :  { %v145_v57 = vsel %vm24_vm12, %v144_v56, %v143_v55 }
  0xc1   :  { %v148_v59 = vsel %vm23_vm13, %v414_v9, %v145_v57 }
  0xc2   :  { %v150_v60 = vmul.f32 %v148_v59, %v148_v59 }
  0xc4   :  { %v151_v61 = vmul.f32 -0.001358992, %v150_v60  ;;  %v158_v62 = vmul.f32 -0.00019511016, %v150_v60 }
  0xc6   :  { %v152_v0 = vadd.f32 0.041655596, %v151_v61  ;;  %v159_v2 = vadd.f32 0.008332121, %v158_v62 }
  0xc8   :  { %v153_v4 = vmul.f32 %v152_v0, %v150_v60  ;;  %v160_v5 = vmul.f32 %v159_v2, %v150_v60 }
  0xca   :  { %v154_v6 = vadd.f32 -0.4999988, %v153_v4  ;;  %v161_v7 = vadd.f32 -0.16666654, %v160_v5 }
  0xcc   :  { %v155_v10 = vmul.f32 %v154_v6, %v150_v60  ;;  %v162_v11 = vmul.f32 %v161_v7, %v150_v60 }
  0xce   :  { %v156_v12 = vadd.f32 1.0, %v155_v10  ;;  %v163_v13 = vadd.f32 1.0, %v162_v11 }
  0xd0   :  { %v164_v16 = vmul.f32 %v163_v13, %v148_v59  ;;  %v173_v17 = vxor.u32 2147483648, %v156_v12 }
  0xd2   :  { %v170_v19 = vxor.u32 2147483648, %v164_v16  ;;  %v174_v23 = vsel %vm172_vm2, %v173_v17, %v164_v16  ;;  %v328_v25 = vsel %vm326_vm3, %v173_v17, %v164_v16 }
  0xd4   :  { %v171_v22 = vsel %vm169_vm1, %v156_v12, %v170_v19  ;;  %v325_v24 = vsel %vm323_vm15, %v156_v12, %v170_v19 }
  0xd5   :  { %v175_v26 = vsel %vm168_vm0, %v171_v22, %v174_v23  ;;  %v329_v27 = vsel %vm322_vm14, %v325_v24, %v328_v25 }
  0xd6   :  { %v176_v28 = vsel %vm165_vm4, nan, %v175_v26  ;;  %v330_v29 = vsel %vm165_vm4, nan, %v329_v27 }
  0xd7   :  { %331 = vst [vmem:[#allocation2] sm:$0xff] %v330_v29 }
  0xd8   :  { %332 = vst [vmem:[#allocation2 + $0x8] sm:$0xff] %v176_v28 }
  0xd9   :  { %343 = dma.vmem_to_hbm [thread:$0]  %s339_s8, 256, %s341_s11, [#allocation3]  }
  0xda   :  { %390 = dma.done.wait [#allocation3], 256  }
  0xdb   :  { %391 = vsyncadd [#allocation3], 4294967040 }
  0xdc   :  { %348 = vsyncpa [#allocation3], 1 }

</bundles_post_ra>
